<compile_context>
chip_gen: v5e
topology: v5e:2x2
jax: 0.10.0
libtpu: 0.0.40
codegen_flags: <defaults>
</compile_context>

<pallas_src>
import functools
import math

import jax
import jax.numpy as jnp
import numpy as np
from jax import lax
from jax.experimental import pallas as pl
from jax.experimental.pallas import tpu as pltpu

_SQRT2 = math.sqrt(2.0)


def _gelu(x):
    # exact (erf-based) GELU, matching torch.nn.GELU() default
    return 0.5 * x * (1.0 + lax.erf(x / _SQRT2))


# ----------------------------------------------------------------------------
# Pallas kernel (one grid step == one batch element; both ConvLayers fused)
# ----------------------------------------------------------------------------
def _conv3_s1(h, w_ref, b_ref, mm):
    """Stride-1, kernel-3, zero-pad-1 conv of h:(T, C) via one im2col matmul."""
    T, C = h.shape
    z = jnp.zeros((1, C), h.dtype)
    hp = jnp.concatenate([z, h, z], axis=0)                              # (T+2, C)
    im = jnp.concatenate([hp[0:T], hp[1:T + 1], hp[2:T + 2]], axis=-1)   # (T, 3C)
    return mm(im, w_ref) + b_ref[...]


def _conv_block_kernel(xz_ref, w1d_ref, b1d_ref, w1a_ref, b1a_ref,
                       w2d_ref, b2d_ref, w2a_ref, b2a_ref, ws_ref, bs_ref,
                       o_ref, *, pool, mxu_dtype):
    # xz_ref: (1, L+2, Cin) zero-padded input (both the convs and, with a halo
    #         mask, the maxpool residual read from it -- no -inf copy).
    # w*d/w*a: (K*Cin, C) im2col weight slabs; ws: (Cin, Cout) 1x1 sampleConv.
    # o_ref:  (1, Lo, Cout)
    Lo = o_ref.shape[1]
    Cin = xz_ref.shape[2]
    L = xz_ref.shape[1] - 2

    def mm(a, w_ref):
        a = a.astype(jnp.float32)
        w = w_ref[...]
        if mxu_dtype is not None:            # MXU-operand cast only; f32 accumulate
            a = a.astype(mxu_dtype)
            w = w.astype(mxu_dtype)
        return jnp.dot(a, w, preferred_element_type=jnp.float32)

    xw = xz_ref[...][0]                      # (L+2, Cin) zero-padded input

    if pool:
        # --- layer 1 taps (stride 2): dense loads + (Lo, 2, C) deinterleave,
        #     no strided sublane reads.
        xa = xw[0:2 * Lo].reshape(Lo, 2, Cin)
        xb = xw[1:2 * Lo + 1].reshape(Lo, 2, Cin)
        t0 = xa[:, 0, :]                     # x_pad[2i]
        t1 = xa[:, 1, :]                     # x_pad[2i+1]
        t2 = xb[:, 1, :]                     # x_pad[2i+2]

        # MaxPool1d(3, 2, 1) residual: reuse the conv taps; only the zero-pad
        # halo rows (row 0 of t0, and row Lo-1 of t2 iff L is odd) need -inf.
        neg_inf = jnp.float32(-jnp.inf)
        row = lax.broadcasted_iota(jnp.int32, (Lo, Cin), 0)
        p0 = jnp.where(row == 0, neg_inf, t0.astype(jnp.float32))
        p2 = t2.astype(jnp.float32)
        if L % 2 == 1:
            p2 = jnp.where(row == Lo - 1, neg_inf, p2)
        resid1 = jnp.maximum(jnp.maximum(p0, t1.astype(jnp.float32)), p2)
    else:
        # --- layer 1 taps (stride 1); identity residual (c_in==c_in, no pool)
        t0 = xw[0:Lo]
        t1 = xw[1:Lo + 1]
        t2 = xw[2:Lo + 2]
        resid1 = t1.astype(jnp.float32)

    # layer 1: downConv (+GELU) as one im2col matmul, then actConv (+GELU) + res
    im1 = jnp.concatenate([t0, t1, t2], axis=-1)                  # (Lo, 3*Cin)
    d1 = _gelu(mm(im1, w1d_ref) + b1d_ref[...])
    h1 = _gelu(_conv3_s1(d1, w1a_ref, b1a_ref, mm)) + resid1      # (Lo, Cin)

    # layer 2 (stride 1): 1x1 sampleConv residual, downConv+GELU, actConv+GELU
    y2 = mm(h1, ws_ref) + bs_ref[...]                             # (Lo, Cout)
    d2 = _gelu(_conv3_s1(h1, w2d_ref, b2d_ref, mm))               # (Lo, Cin)
    out = _gelu(_conv3_s1(d2, w2a_ref, b2a_ref, mm)) + y2         # (Lo, Cout)

    o_ref[...] = out[jnp.newaxis].astype(o_ref.dtype)


# ----------------------------------------------------------------------------
# JAX wrappers (weight-norm, im2col slabs, padding, pallas_call setup)
# ----------------------------------------------------------------------------
def _weight_norm(v, g):
    # torch.nn.utils.weight_norm with dim=0: w = g * v / ||v||_(per out-channel)
    norm = jnp.sqrt(jnp.sum(v * v, axis=(1, 2), keepdims=True))
    return (g.reshape(-1, 1, 1) / norm) * v


def _im2col_slab(w):
    """torch Conv1d weight (Cout, Cin, K) -> (K*Cin, Cout) im2col slab."""
    cout, cin, k = w.shape
    return jnp.transpose(w, (2, 1, 0)).reshape(k * cin, cout)


def conv_block(x, params, pool=True, mxu_dtype=None):
    """ConvBlock.forward: (B, L, c_in) -> (B, Lo, c_out), Lo=ceil(L/2) if pool."""
    B, L, Cin = x.shape
    l1, l2 = params["layer1"], params["layer2"]
    wd1 = _weight_norm(l1["v_down"], l1["g_down"])      # (Cin, Cin, K)
    wa1 = _weight_norm(l1["v_act"], l1["g_act"])        # (Cin, Cin, K)
    wd2 = _weight_norm(l2["v_down"], l2["g_down"])      # (Cin, Cin, K)
    wa2 = _weight_norm(l2["v_act"], l2["g_act"])        # (Cout, Cin, K)
    K = wd1.shape[2]
    Cout = wa2.shape[0]
    Lo = (L - 1) // 2 + 1 if pool else L

    if l2.get("w_sample") is not None:                  # 1x1 sampleConv residual
        ws = l2["w_sample"][:, :, 0].T                  # (Cin, Cout)
        bs = l2["b_sample"]
    else:                                               # c_in == c_out: identity
        ws = jnp.eye(Cin, dtype=jnp.float32)
        bs = jnp.zeros((Cin,), jnp.float32)

    xz = jnp.pad(x, ((0, 0), (1, 1), (0, 0)))           # zero pad (conv padding)

    kernel = functools.partial(_conv_block_kernel, pool=pool, mxu_dtype=mxu_dtype)

    def wspec(shape):
        return pl.BlockSpec(shape, lambda b: (0,) * len(shape))

    # TODO(synk): for long production sequences, tile L with halo windows
    # (grid=(B, L/TILE)) so the input blocks stay well under v7x's 64 MiB VMEM;
    # full-L blocks are fine at these shapes and keep the fused layout simple.
    return pl.pallas_call(
        kernel,
        out_shape=jax.ShapeDtypeStruct((B, Lo, Cout), x.dtype),
        grid_spec=pltpu.PrefetchScalarGridSpec(
            num_scalar_prefetch=0,
            grid=(B,),
            in_specs=[
                pl.BlockSpec((1, L + 2, Cin), lambda b: (b, 0, 0)),
                wspec((K * Cin, Cin)), wspec((1, Cin)),    # downConv1 slab + bias
                wspec((K * Cin, Cin)), wspec((1, Cin)),    # actConv1
                wspec((K * Cin, Cin)), wspec((1, Cin)),    # downConv2
                wspec((K * Cin, Cout)), wspec((1, Cout)),  # actConv2
                wspec((Cin, Cout)), wspec((1, Cout)),      # sampleConv (1x1)
            ],
            out_specs=pl.BlockSpec((1, Lo, Cout), lambda b: (b, 0, 0)),
        ),
        compiler_params=pltpu.CompilerParams(
            dimension_semantics=("parallel",),     # batch sharded over v7x's 2 TCs
            vmem_limit_bytes=48 * 1024 * 1024),
    )(xz,
      _im2col_slab(wd1), l1["b_down"].reshape(1, Cin),
      _im2col_slab(wa1), l1["b_act"].reshape(1, Cin),
      _im2col_slab(wd2), l2["b_down"].reshape(1, Cin),
      _im2col_slab(wa2), l2["b_act"].reshape(1, Cout),
      ws, bs.reshape(1, Cout))


# ----------------------------------------------------------------------------
# Pure-JAX reference (mirrors the PyTorch forward exactly) for verification
# ----------------------------------------------------------------------------
def _ref_conv1d(x_blc, w, b, stride, pad):
    x_ncl = jnp.transpose(x_blc, (0, 2, 1))
    out = lax.conv_general_dilated(
        x_ncl, w, window_strides=(stride,), padding=[(pad, pad)],
        dimension_numbers=("NCH", "OIH", "NCH"))
    out = out + b[None, :, None]
    return jnp.transpose(out, (0, 2, 1))


def _ref_maxpool1d(x_blc):
    x_ncl = jnp.transpose(x_blc, (0, 2, 1))
    out = lax.reduce_window(x_ncl, -jnp.inf, lax.max,
                            window_dimensions=(1, 1, 3),
                            window_strides=(1, 1, 2),
                            padding=[(0, 0), (0, 0), (1, 1)])
    return jnp.transpose(out, (0, 2, 1))


def _ref_convlayer(x, wd, bd, wa, ba, ws, bs, s):
    y = x
    if ws is not None:
        y = _ref_conv1d(y, ws, bs, 1, 0)
    if s != 1:
        y = _ref_maxpool1d(y)
    h = _ref_conv1d(x, wd, bd, s, (wd.shape[2] - 1) // 2)
    h = jax.nn.gelu(h, approximate=False)
    h = _ref_conv1d(h, wa, ba, 1, (wa.shape[2] - 1) // 2)
    h = jax.nn.gelu(h, approximate=False)
    return h + y


def ref_conv_block(x, params, pool=True):
    l1, l2 = params["layer1"], params["layer2"]
    wd1 = _weight_norm(l1["v_down"], l1["g_down"])
    wa1 = _weight_norm(l1["v_act"], l1["g_act"])
    wd2 = _weight_norm(l2["v_down"], l2["g_down"])
    wa2 = _weight_norm(l2["v_act"], l2["g_act"])
    h = _ref_convlayer(x, wd1, l1["b_down"], wa1, l1["b_act"],
                       None, None, 2 if pool else 1)
    h = _ref_convlayer(h, wd2, l2["b_down"], wa2, l2["b_act"],
                       l2.get("w_sample"), l2.get("b_sample"), 1)
    return h


# ----------------------------------------------------------------------------
# Deterministic parameter init (shapes from ConvBlock.__init__)
# ----------------------------------------------------------------------------
def init_params(key, c_in, c_out, kernel=3):
    ks = jax.random.split(key, 16)
    w = lambda k, shape, s=0.2: s * jax.random.normal(k, shape, jnp.float32)
    g = lambda k, n: 1.0 + 0.1 * jax.random.normal(k, (n,), jnp.float32)
    layer1 = {
        "v_down": w(ks[0], (c_in, c_in, kernel)), "g_down": g(ks[1], c_in),
        "b_down": w(ks[2], (c_in,), 0.1),
        "v_act": w(ks[3], (c_in, c_in, kernel)), "g_act": g(ks[4], c_in),
        "b_act": w(ks[5], (c_in,), 0.1),
    }
    layer2 = {
        "v_down": w(ks[6], (c_in, c_in, kernel)), "g_down": g(ks[7], c_in),
        "b_down": w(ks[8], (c_in,), 0.1),
        "v_act": w(ks[9], (c_out, c_in, kernel)), "g_act": g(ks[10], c_out),
        "b_act": w(ks[11], (c_out,), 0.1),
        "w_sample": w(ks[12], (c_out, c_in, 1)) if c_in != c_out else None,
        "b_sample": w(ks[13], (c_out,), 0.1) if c_in != c_out else None,
    }
    return {"layer1": layer1, "layer2": layer2}


if __name__ == "__main__":
    key = jax.random.PRNGKey(0)
    kx, kp = jax.random.split(key)
    B, L, c_in, c_out = 2, 16, 4, 8
    x = jax.random.normal(kx, (B, L, c_in), dtype=jnp.float32)
    params = init_params(kp, c_in, c_out, kernel=3)

    # pool=True (stride-2 downConv + maxpool residual), f32 MXU operands
    out = jax.block_until_ready(
        jax.jit(functools.partial(conv_block, pool=True))(x, params))
    assert out.shape == (B, L // 2, c_out), out.shape
    ref = ref_conv_block(x, params, pool=True)
    np.testing.assert_allclose(np.asarray(out), np.asarray(ref),
                               atol=2e-4, rtol=2e-4)

    # pool=False (both layers stride 1, identity residual in layer 1)
    out_np = jax.block_until_ready(
        jax.jit(functools.partial(conv_block, pool=False))(x, params))
    assert out_np.shape == (B, L, c_out), out_np.shape
    np.testing.assert_allclose(np.asarray(out_np),
                               np.asarray(ref_conv_block(x, params, pool=False)),
                               atol=2e-4, rtol=2e-4)

    # odd sequence length exercises the right-edge maxpool halo fix
    x_odd = jax.random.normal(kx, (B, 15, c_in), dtype=jnp.float32)
    out_odd = jax.block_until_ready(
        jax.jit(functools.partial(conv_block, pool=True))(x_odd, params))
    np.testing.assert_allclose(np.asarray(out_odd),
                               np.asarray(ref_conv_block(x_odd, params, pool=True)),
                               atol=2e-4, rtol=2e-4)

    # bf16 MXU operands (v5e/v6e/v7x fast path); accumulation/VPU work stays f32
    out_bf = jax.block_until_ready(
        jax.jit(functools.partial(conv_block, pool=True,
                                  mxu_dtype=jnp.bfloat16))(x, params))
    np.testing.assert_allclose(np.asarray(out_bf), np.asarray(ref),
                               atol=1e-1, rtol=1e-1)

    print("KERNEL_OK")
</pallas_src>

<mosaic_0001>
module attributes {stable_mosaic.version = 11 : i64} {
  func.func @_conv_block_kernel(%arg0: i32, %arg1: memref<1x18x4xf32, #tpu.memory_space<vmem>>, %arg2: memref<12x4xf32, #tpu.memory_space<vmem>>, %arg3: memref<1x4xf32, #tpu.memory_space<vmem>>, %arg4: memref<12x4xf32, #tpu.memory_space<vmem>>, %arg5: memref<1x4xf32, #tpu.memory_space<vmem>>, %arg6: memref<12x4xf32, #tpu.memory_space<vmem>>, %arg7: memref<1x4xf32, #tpu.memory_space<vmem>>, %arg8: memref<12x8xf32, #tpu.memory_space<vmem>>, %arg9: memref<1x8xf32, #tpu.memory_space<vmem>>, %arg10: memref<4x8xf32, #tpu.memory_space<vmem>>, %arg11: memref<1x8xf32, #tpu.memory_space<vmem>>, %arg12: memref<1x8x8xf32, #tpu.memory_space<vmem>>) attributes {dimension_semantics = [#tpu.dimension_semantics<parallel>], iteration_bounds = array<i64: 2>, scalar_prefetch = 0 : i64, scratch_operands = 0 : i64, tpu.core_type = #tpu.core_type<tc>, window_params = [{transform_indices = @transform_0, window_bounds = array<i64: 1, 18, 4>}, {pipeline_mode = #tpu.pipeline_mode<synchronous>, transform_indices = @transform_1, window_bounds = array<i64: 12, 4>}, {pipeline_mode = #tpu.pipeline_mode<synchronous>, transform_indices = @transform_2, window_bounds = array<i64: 1, 4>}, {pipeline_mode = #tpu.pipeline_mode<synchronous>, transform_indices = @transform_3, window_bounds = array<i64: 12, 4>}, {pipeline_mode = #tpu.pipeline_mode<synchronous>, transform_indices = @transform_4, window_bounds = array<i64: 1, 4>}, {pipeline_mode = #tpu.pipeline_mode<synchronous>, transform_indices = @transform_5, window_bounds = array<i64: 12, 4>}, {pipeline_mode = #tpu.pipeline_mode<synchronous>, transform_indices = @transform_6, window_bounds = array<i64: 1, 4>}, {pipeline_mode = #tpu.pipeline_mode<synchronous>, transform_indices = @transform_7, window_bounds = array<i64: 12, 8>}, {pipeline_mode = #tpu.pipeline_mode<synchronous>, transform_indices = @transform_8, window_bounds = array<i64: 1, 8>}, {pipeline_mode = #tpu.pipeline_mode<synchronous>, transform_indices = @transform_9, window_bounds = array<i64: 4, 8>}, {pipeline_mode = #tpu.pipeline_mode<synchronous>, transform_indices = @transform_10, window_bounds = array<i64: 1, 8>}, {transform_indices = @transform_11, window_bounds = array<i64: 1, 8, 8>}]} {
    %c0 = arith.constant 0 : index
    %c0_0 = arith.constant 0 : index
    %c0_1 = arith.constant 0 : index
    %0 = vector.load %arg1[%c0, %c0_0, %c0_1] : memref<1x18x4xf32, #tpu.memory_space<vmem>>, vector<1x18x4xf32>
    %1 = vector.shape_cast %0 : vector<1x18x4xf32> to vector<18x4xf32>
    %2 = vector.extract_strided_slice %1 {offsets = [0, 0], sizes = [16, 4], strides = [1, 1]} : vector<18x4xf32> to vector<16x4xf32>
    %3 = vector.shape_cast %2 : vector<16x4xf32> to vector<8x2x4xf32>
    %4 = vector.extract_strided_slice %1 {offsets = [1, 0], sizes = [16, 4], strides = [1, 1]} : vector<18x4xf32> to vector<16x4xf32>
    %5 = vector.shape_cast %4 : vector<16x4xf32> to vector<8x2x4xf32>
    %6 = vector.extract_strided_slice %3 {offsets = [0, 0, 0], sizes = [8, 1, 4], strides = [1, 1, 1]} : vector<8x2x4xf32> to vector<8x1x4xf32>
    %7 = vector.shape_cast %6 : vector<8x1x4xf32> to vector<8x4xf32>
    %8 = vector.extract_strided_slice %3 {offsets = [0, 1, 0], sizes = [8, 1, 4], strides = [1, 1, 1]} : vector<8x2x4xf32> to vector<8x1x4xf32>
    %9 = vector.shape_cast %8 : vector<8x1x4xf32> to vector<8x4xf32>
    %10 = vector.extract_strided_slice %5 {offsets = [0, 1, 0], sizes = [8, 1, 4], strides = [1, 1, 1]} : vector<8x2x4xf32> to vector<8x1x4xf32>
    %11 = vector.shape_cast %10 : vector<8x1x4xf32> to vector<8x4xf32>
    %12 = tpu.iota {dimensions = array<i32: 0>} : vector<8x4xi32>
    %c0_i32 = arith.constant 0 : i32
    %13 = vector.broadcast %c0_i32 : i32 to vector<8x4xi32>
    %14 = arith.cmpi eq, %12, %13 : vector<8x4xi32>
    %cst = arith.constant 0xFF800000 : f32
    %15 = vector.broadcast %cst : f32 to vector<8x4xf32>
    %16 = arith.select %14, %15, %7 : vector<8x4xi1>, vector<8x4xf32>
    %17 = arith.maximumf %16, %9 : vector<8x4xf32>
    %18 = arith.maximumf %17, %11 : vector<8x4xf32>
    %19 = tpu.concatenate %7, %9, %11 in 1 : vector<8x4xf32>, vector<8x4xf32>, vector<8x4xf32> -> vector<8x12xf32>
    %c0_2 = arith.constant 0 : index
    %c0_3 = arith.constant 0 : index
    %20 = vector.load %arg2[%c0_2, %c0_3] : memref<12x4xf32, #tpu.memory_space<vmem>>, vector<12x4xf32>
    %cst_4 = arith.constant dense<0.000000e+00> : vector<8x4xf32>
    %21 = tpu.matmul %19, %20, %cst_4 {dimension_numbers = #tpu.dot_dimension_numbers<[1], [0], [0], [1], [0, 0, 1, 1], [], []>} : vector<8x12xf32>, vector<12x4xf32>, vector<8x4xf32> -> vector<8x4xf32>
    %c0_5 = arith.constant 0 : index
    %c0_6 = arith.constant 0 : index
    %22 = vector.load %arg3[%c0_5, %c0_6] : memref<1x4xf32, #tpu.memory_space<vmem>>, vector<1x4xf32>
    %23 = vector.broadcast %22 : vector<1x4xf32> to vector<8x4xf32>
    %24 = arith.addf %21, %23 : vector<8x4xf32>
    %cst_7 = arith.constant 5.000000e-01 : f32
    %25 = vector.broadcast %cst_7 : f32 to vector<8x4xf32>
    %26 = arith.mulf %25, %24 : vector<8x4xf32>
    %cst_8 = arith.constant 1.41421354 : f32
    %27 = vector.broadcast %cst_8 : f32 to vector<8x4xf32>
    %28 = arith.divf %24, %27 : vector<8x4xf32>
    %29 = math.erf %28 : vector<8x4xf32>
    %cst_9 = arith.constant 1.000000e+00 : f32
    %30 = vector.broadcast %cst_9 : f32 to vector<8x4xf32>
    %31 = arith.addf %30, %29 : vector<8x4xf32>
    %32 = arith.mulf %26, %31 : vector<8x4xf32>
    %cst_10 = arith.constant 0.000000e+00 : f32
    %33 = vector.broadcast %cst_10 : f32 to vector<1x4xf32>
    %34 = tpu.concatenate %33, %32, %33 in 0 : vector<1x4xf32>, vector<8x4xf32>, vector<1x4xf32> -> vector<10x4xf32>
    %35 = vector.extract_strided_slice %34 {offsets = [0, 0], sizes = [8, 4], strides = [1, 1]} : vector<10x4xf32> to vector<8x4xf32>
    %36 = vector.extract_strided_slice %34 {offsets = [1, 0], sizes = [8, 4], strides = [1, 1]} : vector<10x4xf32> to vector<8x4xf32>
    %37 = vector.extract_strided_slice %34 {offsets = [2, 0], sizes = [8, 4], strides = [1, 1]} : vector<10x4xf32> to vector<8x4xf32>
    %38 = tpu.concatenate %35, %36, %37 in 1 : vector<8x4xf32>, vector<8x4xf32>, vector<8x4xf32> -> vector<8x12xf32>
    %c0_11 = arith.constant 0 : index
    %c0_12 = arith.constant 0 : index
    %39 = vector.load %arg4[%c0_11, %c0_12] : memref<12x4xf32, #tpu.memory_space<vmem>>, vector<12x4xf32>
    %cst_13 = arith.constant dense<0.000000e+00> : vector<8x4xf32>
    %40 = tpu.matmul %38, %39, %cst_13 {dimension_numbers = #tpu.dot_dimension_numbers<[1], [0], [0], [1], [0, 0, 1, 1], [], []>} : vector<8x12xf32>, vector<12x4xf32>, vector<8x4xf32> -> vector<8x4xf32>
    %c0_14 = arith.constant 0 : index
    %c0_15 = arith.constant 0 : index
    %41 = vector.load %arg5[%c0_14, %c0_15] : memref<1x4xf32, #tpu.memory_space<vmem>>, vector<1x4xf32>
    %42 = vector.broadcast %41 : vector<1x4xf32> to vector<8x4xf32>
    %43 = arith.addf %40, %42 : vector<8x4xf32>
    %cst_16 = arith.constant 5.000000e-01 : f32
    %44 = vector.broadcast %cst_16 : f32 to vector<8x4xf32>
    %45 = arith.mulf %44, %43 : vector<8x4xf32>
    %cst_17 = arith.constant 1.41421354 : f32
    %46 = vector.broadcast %cst_17 : f32 to vector<8x4xf32>
    %47 = arith.divf %43, %46 : vector<8x4xf32>
    %48 = math.erf %47 : vector<8x4xf32>
    %cst_18 = arith.constant 1.000000e+00 : f32
    %49 = vector.broadcast %cst_18 : f32 to vector<8x4xf32>
    %50 = arith.addf %49, %48 : vector<8x4xf32>
    %51 = arith.mulf %45, %50 : vector<8x4xf32>
    %52 = arith.addf %51, %18 : vector<8x4xf32>
    %c0_19 = arith.constant 0 : index
    %c0_20 = arith.constant 0 : index
    %53 = vector.load %arg10[%c0_19, %c0_20] : memref<4x8xf32, #tpu.memory_space<vmem>>, vector<4x8xf32>
    %cst_21 = arith.constant dense<0.000000e+00> : vector<8x8xf32>
    %54 = tpu.matmul %52, %53, %cst_21 {dimension_numbers = #tpu.dot_dimension_numbers<[1], [0], [0], [1], [0, 0, 1, 1], [], []>} : vector<8x4xf32>, vector<4x8xf32>, vector<8x8xf32> -> vector<8x8xf32>
    %c0_22 = arith.constant 0 : index
    %c0_23 = arith.constant 0 : index
    %55 = vector.load %arg11[%c0_22, %c0_23] : memref<1x8xf32, #tpu.memory_space<vmem>>, vector<1x8xf32>
    %56 = vector.broadcast %55 : vector<1x8xf32> to vector<8x8xf32>
    %57 = arith.addf %54, %56 : vector<8x8xf32>
    %cst_24 = arith.constant 0.000000e+00 : f32
    %58 = vector.broadcast %cst_24 : f32 to vector<1x4xf32>
    %59 = tpu.concatenate %58, %52, %58 in 0 : vector<1x4xf32>, vector<8x4xf32>, vector<1x4xf32> -> vector<10x4xf32>
    %60 = vector.extract_strided_slice %59 {offsets = [0, 0], sizes = [8, 4], strides = [1, 1]} : vector<10x4xf32> to vector<8x4xf32>
    %61 = vector.extract_strided_slice %59 {offsets = [1, 0], sizes = [8, 4], strides = [1, 1]} : vector<10x4xf32> to vector<8x4xf32>
    %62 = vector.extract_strided_slice %59 {offsets = [2, 0], sizes = [8, 4], strides = [1, 1]} : vector<10x4xf32> to vector<8x4xf32>
    %63 = tpu.concatenate %60, %61, %62 in 1 : vector<8x4xf32>, vector<8x4xf32>, vector<8x4xf32> -> vector<8x12xf32>
    %c0_25 = arith.constant 0 : index
    %c0_26 = arith.constant 0 : index
    %64 = vector.load %arg6[%c0_25, %c0_26] : memref<12x4xf32, #tpu.memory_space<vmem>>, vector<12x4xf32>
    %cst_27 = arith.constant dense<0.000000e+00> : vector<8x4xf32>
    %65 = tpu.matmul %63, %64, %cst_27 {dimension_numbers = #tpu.dot_dimension_numbers<[1], [0], [0], [1], [0, 0, 1, 1], [], []>} : vector<8x12xf32>, vector<12x4xf32>, vector<8x4xf32> -> vector<8x4xf32>
    %c0_28 = arith.constant 0 : index
    %c0_29 = arith.constant 0 : index
    %66 = vector.load %arg7[%c0_28, %c0_29] : memref<1x4xf32, #tpu.memory_space<vmem>>, vector<1x4xf32>
    %67 = vector.broadcast %66 : vector<1x4xf32> to vector<8x4xf32>
    %68 = arith.addf %65, %67 : vector<8x4xf32>
    %cst_30 = arith.constant 5.000000e-01 : f32
    %69 = vector.broadcast %cst_30 : f32 to vector<8x4xf32>
    %70 = arith.mulf %69, %68 : vector<8x4xf32>
    %cst_31 = arith.constant 1.41421354 : f32
    %71 = vector.broadcast %cst_31 : f32 to vector<8x4xf32>
    %72 = arith.divf %68, %71 : vector<8x4xf32>
    %73 = math.erf %72 : vector<8x4xf32>
    %cst_32 = arith.constant 1.000000e+00 : f32
    %74 = vector.broadcast %cst_32 : f32 to vector<8x4xf32>
    %75 = arith.addf %74, %73 : vector<8x4xf32>
    %76 = arith.mulf %70, %75 : vector<8x4xf32>
    %cst_33 = arith.constant 0.000000e+00 : f32
    %77 = vector.broadcast %cst_33 : f32 to vector<1x4xf32>
    %78 = tpu.concatenate %77, %76, %77 in 0 : vector<1x4xf32>, vector<8x4xf32>, vector<1x4xf32> -> vector<10x4xf32>
    %79 = vector.extract_strided_slice %78 {offsets = [0, 0], sizes = [8, 4], strides = [1, 1]} : vector<10x4xf32> to vector<8x4xf32>
    %80 = vector.extract_strided_slice %78 {offsets = [1, 0], sizes = [8, 4], strides = [1, 1]} : vector<10x4xf32> to vector<8x4xf32>
    %81 = vector.extract_strided_slice %78 {offsets = [2, 0], sizes = [8, 4], strides = [1, 1]} : vector<10x4xf32> to vector<8x4xf32>
    %82 = tpu.concatenate %79, %80, %81 in 1 : vector<8x4xf32>, vector<8x4xf32>, vector<8x4xf32> -> vector<8x12xf32>
    %c0_34 = arith.constant 0 : index
    %c0_35 = arith.constant 0 : index
    %83 = vector.load %arg8[%c0_34, %c0_35] : memref<12x8xf32, #tpu.memory_space<vmem>>, vector<12x8xf32>
    %cst_36 = arith.constant dense<0.000000e+00> : vector<8x8xf32>
    %84 = tpu.matmul %82, %83, %cst_36 {dimension_numbers = #tpu.dot_dimension_numbers<[1], [0], [0], [1], [0, 0, 1, 1], [], []>} : vector<8x12xf32>, vector<12x8xf32>, vector<8x8xf32> -> vector<8x8xf32>
    %c0_37 = arith.constant 0 : index
    %c0_38 = arith.constant 0 : index
    %85 = vector.load %arg9[%c0_37, %c0_38] : memref<1x8xf32, #tpu.memory_space<vmem>>, vector<1x8xf32>
    %86 = vector.broadcast %85 : vector<1x8xf32> to vector<8x8xf32>
    %87 = arith.addf %84, %86 : vector<8x8xf32>
    %cst_39 = arith.constant 5.000000e-01 : f32
    %88 = vector.broadcast %cst_39 : f32 to vector<8x8xf32>
    %89 = arith.mulf %88, %87 : vector<8x8xf32>
    %cst_40 = arith.constant 1.41421354 : f32
    %90 = vector.broadcast %cst_40 : f32 to vector<8x8xf32>
    %91 = arith.divf %87, %90 : vector<8x8xf32>
    %92 = math.erf %91 : vector<8x8xf32>
    %cst_41 = arith.constant 1.000000e+00 : f32
    %93 = vector.broadcast %cst_41 : f32 to vector<8x8xf32>
    %94 = arith.addf %93, %92 : vector<8x8xf32>
    %95 = arith.mulf %89, %94 : vector<8x8xf32>
    %96 = arith.addf %95, %57 : vector<8x8xf32>
    %97 = vector.shape_cast %96 : vector<8x8xf32> to vector<1x8x8xf32>
    %c0_42 = arith.constant 0 : index
    %c0_43 = arith.constant 0 : index
    %c0_44 = arith.constant 0 : index
    %98 = vector.load %arg12[%c0_42, %c0_43, %c0_44] : memref<1x8x8xf32, #tpu.memory_space<vmem>>, vector<1x8x8xf32>
    tpu.vector_store %arg12[%c0_42, %c0_43, %c0_44], %97 {strides = array<i32>} : memref<1x8x8xf32, #tpu.memory_space<vmem>>, vector<1x8x8xf32>,
    return
  }
  func.func @transform_0(%arg0: i32) -> (i32, i32, i32) {
    %c0_i32 = arith.constant 0 : i32
    %c0_i32_0 = arith.constant 0 : i32
    %c0_i32_1 = arith.constant 0 : i32
    return %arg0, %c0_i32, %c0_i32_0 : i32, i32, i32
  }
  func.func @transform_1(%arg0: i32) -> (i32, i32) {
    %c0_i32 = arith.constant 0 : i32
    %c0_i32_0 = arith.constant 0 : i32
    %c0_i32_1 = arith.constant 0 : i32
    return %c0_i32, %c0_i32_0 : i32, i32
  }
  func.func @transform_2(%arg0: i32) -> (i32, i32) {
    %c0_i32 = arith.constant 0 : i32
    %c0_i32_0 = arith.constant 0 : i32
    %c0_i32_1 = arith.constant 0 : i32
    return %c0_i32, %c0_i32_0 : i32, i32
  }
  func.func @transform_3(%arg0: i32) -> (i32, i32) {
    %c0_i32 = arith.constant 0 : i32
    %c0_i32_0 = arith.constant 0 : i32
    %c0_i32_1 = arith.constant 0 : i32
    return %c0_i32, %c0_i32_0 : i32, i32
  }
  func.func @transform_4(%arg0: i32) -> (i32, i32) {
    %c0_i32 = arith.constant 0 : i32
    %c0_i32_0 = arith.constant 0 : i32
    %c0_i32_1 = arith.constant 0 : i32
    return %c0_i32, %c0_i32_0 : i32, i32
  }
  func.func @transform_5(%arg0: i32) -> (i32, i32) {
    %c0_i32 = arith.constant 0 : i32
    %c0_i32_0 = arith.constant 0 : i32
    %c0_i32_1 = arith.constant 0 : i32
    return %c0_i32, %c0_i32_0 : i32, i32
  }
  func.func @transform_6(%arg0: i32) -> (i32, i32) {
    %c0_i32 = arith.constant 0 : i32
    %c0_i32_0 = arith.constant 0 : i32
    %c0_i32_1 = arith.constant 0 : i32
    return %c0_i32, %c0_i32_0 : i32, i32
  }
  func.func @transform_7(%arg0: i32) -> (i32, i32) {
    %c0_i32 = arith.constant 0 : i32
    %c0_i32_0 = arith.constant 0 : i32
    %c0_i32_1 = arith.constant 0 : i32
    return %c0_i32, %c0_i32_0 : i32, i32
  }
  func.func @transform_8(%arg0: i32) -> (i32, i32) {
    %c0_i32 = arith.constant 0 : i32
    %c0_i32_0 = arith.constant 0 : i32
    %c0_i32_1 = arith.constant 0 : i32
    return %c0_i32, %c0_i32_0 : i32, i32
  }
  func.func @transform_9(%arg0: i32) -> (i32, i32) {
    %c0_i32 = arith.constant 0 : i32
    %c0_i32_0 = arith.constant 0 : i32
    %c0_i32_1 = arith.constant 0 : i32
    return %c0_i32, %c0_i32_0 : i32, i32
  }
  func.func @transform_10(%arg0: i32) -> (i32, i32) {
    %c0_i32 = arith.constant 0 : i32
    %c0_i32_0 = arith.constant 0 : i32
    %c0_i32_1 = arith.constant 0 : i32
    return %c0_i32, %c0_i32_0 : i32, i32
  }
  func.func @transform_11(%arg0: i32) -> (i32, i32, i32) {
    %c0_i32 = arith.constant 0 : i32
    %c0_i32_0 = arith.constant 0 : i32
    %c0_i32_1 = arith.constant 0 : i32
    return %arg0, %c0_i32, %c0_i32_0 : i32, i32, i32
  }
}

</mosaic_0001>

<bundles_post_ra>
// kernel: conv_block.1
= control target key start
LH: loop header
LB: loop body
LE: loop exit
PB: predicated region body
PF: predicated region fallthrough
CT: control target
= control target key end

     0   :  { %s1428_s0 = inlined_call_operand.vmem [shape: f32[2,18,4], index: 0, kind: input, shape index: {}]   ;;  %s1429_s1 = inlined_call_operand.vmem [shape: f32[12,4], index: 1, kind: input, shape index: {}]   ;;  %s1430_s2 = inlined_call_operand.vmem [shape: f32[1,4], index: 2, kind: input, shape index: {}]   ;;  %s1431_s3 = inlined_call_operand.vmem [shape: f32[12,4], index: 3, kind: input, shape index: {}]   ;;  %s1432_s4 = inlined_call_operand.vmem [shape: f32[1,4], index: 4, kind: input, shape index: {}]   ;;  %s1433_s5 = inlined_call_operand.vmem [shape: f32[12,4], index: 5, kind: input, shape index: {}]   ;;  %s1434_s6 = inlined_call_operand.vmem [shape: f32[1,4], index: 6, kind: input, shape index: {}]   ;;  %s1435_s7 = inlined_call_operand.vmem [shape: f32[12,8], index: 7, kind: input, shape index: {}]   ;;  %s1436_s8 = inlined_call_operand.vmem [shape: f32[1,8], index: 8, kind: input, shape index: {}]   ;;  %s1437_s9 = inlined_call_operand.vmem [shape: f32[4,8], index: 9, kind: input, shape index: {}]   ;;  %s1438_s10 = inlined_call_operand.vmem [shape: f32[1,8], index: 10, kind: input, shape index: {}]   ;;  %s1439_s11 = inlined_call_operand.hbm [shape: f32[2,8,8], index: 11, kind: output, shape index: {}]  }
   0x1   :  { %1440 = sst [smem:[#allocation5_spill]] %s1428_s0 }
   0x2   :  { %16 = vsyncpa [#allocation3], 0 }
   0x3   :  { %18 = vsyncpa [#allocation3 + $0x1], 0  ;;  %s1193_s17 = smov 0   ;;  %s1195_s18 = smov 0  }
   0x4   :  { %s1197_s19 = smov 0   ;;  %s1199_s20 = smov 0  }
   0x5 LB: > { %s1214_s21 = sadd.s32 4294967295, %s1128_s20   ;;  %s983_s22 = sadd.s32 4294967294, %s1128_s20   ;;  %s1128_s20 = sphi %s1199_s20, %s1449_s20   ;;  %s1124_s19 = sphi %s1197_s19, %s1448_s19   ;;  %s1120_s18 = sphi %s1195_s18, %s1447_s18   ;;  %s1116_s17 = sphi %s1193_s17, %s1446_s17  }
   0x6   : > { %s1218_s23 = sadd.s32 1, %s1128_s20   ;;  %s267_s24 = sadd.s32 1, %s1124_s19 }
   0x7   : > { %s264_s25 = ssub.s32 %s1128_s20, %s1218_s23  ;;  %p277_p0 = scmp.ne.s32.totalorder %s1124_s19, %s1120_s18 }
   0x8   : > { %p265_p1 = scmp.eq.s32.totalorder %s264_s25, 0  ;;  %p278_p2 = scmp.eq.s32.totalorder %s1214_s21, 1 }
   0x9   : > { %p283_p3 = scmp.ne.s32.totalorder %s1120_s18, %s1116_s17  ;;  %p284_p4 = scmp.eq.s32.totalorder %s983_s22, 1 }
   0xa   : > { %s1229_s26 = scalar_select %p265_p1, %s1124_s19, %s267_s24  }
   0xb   : > { %p1231_p5 = por %p278_p2, %p277_p0  ;;  %p1235_p6 = por %p284_p4, %p283_p3 }
   0xc   : > { %p986_p7 = scmp.ge.s32.totalorder %s1128_s20, 1  ;;  %p340_p8 = scmp.lt.s32.totalorder %s1128_s20, 3 }
   0xe   : > { %p341_p9 = pnand %p986_p7, %p340_p8 }
   0xf   : > { %p380_p10 = scmp.lt.s32.totalorder (!%p341_p9), %s1214_s21, 1  ;;  %s1443_s0 = sld [smem:[#allocation5_spill]] (!%p341_p9) }
  0x10   : > { %344 = sbr.rel (%p341_p9) target bundleno = 1260 (0x4ec), region = 64  ;;  %s1130_s15 = smov (!%p341_p9), 4  }
  0x11   : > { %s1131_s16 = smov (!%p341_p9), 8   ;;  %s1005_s25 = sshll.u32 (!%p341_p9), %s1214_s21, 3 }
  0x15   : > { %s381_s29 = scalar_select %p380_p10, %s1214_s21, 1  ;;  %v429_v0 = vlaneseq  ;;  %vm397_vm0 = vcmask 1040384   ;;  %vm398_vm1 = vcmask 1042434   ;;  %vm400_vm2 = vcmask 1044484  }
  0x16   : > { %vm402_vm3 = vcmask 1046534   ;;  %vm399_vm4 = vmor %vm397_vm0, %vm398_vm1  ;;  %vm440_vm5 = vcmask 1041409   ;;  %vm443_vm6 = vcmask 1043459   ;;  %vm446_vm7 = vcmask 1045509  }
  0x17   : > { %s1008_s30 = smul.u32 24, %s381_s29  ;;  %v1252_v3 = vshrl.u32 %v429_v0, 7  ;;  %vm449_vm8 = vcmask 1047559   ;;  %vm401_vm9 = vmor %vm399_vm4, %vm400_vm2  ;;  %vm507_vm12 = vcmask 1043456   ;;  %vm493_vm13 = vcmask 31744  }
  0x18   : > { %vm1260_vm11 = vmor %vm401_vm9, %vm402_vm3  ;;  %vm495_vm14 = vcmask 64512   ;;  %vm503_vm15 = vcmask 97280  }
  0x19   : > { %s1246_s14 = scalar_lea.vmem %s1443_s0, %s1008_s30  ;;  %vm431_vm10 = vcmp.eq.s32.totalorder %v1252_v3, 0 }
  0x1a   : > { %v385_v1 = vld [vmem:[%s1246_s14] sm:$0xff]  ;;  %v386_v2 = vld [vmem:[%s1246_s14 + $0x8] sm:$0xff]  ;;  %v387_v47 = vld [vmem:[%s1246_s14 + $0x10] sm:$0x3]  ;;  %s919_s14 = scalar_lea.hbm %s1439_s11, %s1005_s25 }
  0x1b   : > { %v390_v4 = vrot.slane %v385_v1, 2  ;;  %v391_v5 = vrot.slane %v385_v1, 4  ;;  %v392_v6 = vrot.slane %v385_v1, 6  ;;  %v393_v7 = vrot.slane %v386_v2, 2  ;;  %s923_s0 = sshll.u32 %s919_s14, 4  ;;  %s924_s0 = int_to_ptr.hbm [resolvable:$true] %s923_s0 }
  0x1c   : > { %v394_v8 = vrot.slane %v386_v2, 4  ;;  %v1254_v9 = vrot.slane %v386_v2, 6  ;;  %v432_v10 = vperm.slane %v385_v1, 0  ;;  %v436_v11 = vperm.slane %v386_v2, 0  ;;  %s1080_s29 = sshra.s32 %s924_s0, 4  ;;  %s1081_s29 = int_to_ptr.hbm [resolvable:$true] %s1080_s29 }
  0x1d   : > { %v434_v12 = vperm.slane %v391_v5, 0  ;;  %v435_v13 = vperm.slane %v392_v6, 0  ;;  %v437_v14 = vperm.slane %v393_v7, 0  ;;  %v453_v15 = vperm.slane %v385_v1, 1  ;;  %s1082_s30 = scalar_lea.hbm %s1081_s29, 8  ;;  %p1087_p0 = scmp.lt.s32.totalorder %s1081_s29, %s1439_s11 }
  0x1e   : > { %v438_v16 = vperm.slane %v394_v8, 0  ;;  %v439_v17 = vperm.slane %v1254_v9, 0  ;;  %v454_v18 = vperm.slane %v390_v4, 1  ;;  %v455_v19 = vperm.slane %v391_v5, 1  ;;  %p1083_p11 = scmp.ne.s32.totalorder %s1081_s29, %s1082_s30 }
  0x1f   : > { %v456_v20 = vperm.slane %v392_v6, 1  ;;  %v457_v21 = vperm.slane %v386_v2, 1  ;;  %v458_v22 = vperm.slane %v393_v7, 1  ;;  %v459_v23 = vperm.slane %v394_v8, 1 }
  0x20   : > { %v460_v25 = vperm.slane %v1254_v9, 1  ;;  %v461_v26 = vsel %vm440_vm5, %v454_v18, %v453_v15  ;;  %v433_v27 = vperm.slane %v390_v4, 0  ;;  %v989_v28 = vrot.slane %v385_v1, 9  ;;  %p1084_p12 = pnand %p1083_p11, %p1231_p5 }
  0x21   : > { %v462_v29 = vsel %vm398_vm1, %v455_v19, %v461_v26  ;;  %v406_v30 = vrot.slane %v390_v4, 7  ;;  %v409_v31 = vrot.slane %v391_v5, 7  ;;  %v412_v32 = vrot.slane %v392_v6, 7 }
  0x22   : > { %v463_v33 = vsel %vm443_vm6, %v456_v20, %v462_v29  ;;  %v441_v34 = vsel %vm440_vm5, %v433_v27, %v432_v10  ;;  %v415_v35 = vrot.slane %v386_v2, 7  ;;  %v418_v36 = vrot.slane %v393_v7, 7  ;;  %v498_v20 = vld [vmem:[%s1429_s1 + $0x8] sm:$0xf]  ;;  %p1085_p13 = pneg %p1084_p12 }
  0x23   : > { %v464_v37 = vsel %vm400_vm2, %v457_v21, %v463_v33  ;;  %v442_v38 = vsel %vm398_vm1, %v434_v12, %v441_v34  ;;  %v407_v39 = vsel %vm1260_vm11, %v989_v28, %v406_v30  ;;  %v408_v40 = vrot.slane %v406_v30, 2  ;;  %990 = vmatpush.msk.msra.mxu0 %vm507_vm12, %v498_v20  ;;  %v497_v21 = vld [vmem:[%s1429_s1] sm:$0xff] }
  0x24   : > { %v465_v41 = vsel %vm446_vm7, %v458_v22, %v464_v37  ;;  %v444_v42 = vsel %vm443_vm6, %v435_v13, %v442_v38  ;;  %v411_v43 = vrot.slane %v409_v31, 2  ;;  %v414_v44 = vrot.slane %v412_v32, 2 }
  0x25   : > { %v466_v45 = vsel %vm402_vm3, %v459_v23, %v465_v41  ;;  %v445_v46 = vsel %vm400_vm2, %v436_v11, %v444_v42  ;;  %v410_v48 = vsel %vm1260_vm11, %v408_v40, %v409_v31  ;;  %v417_v49 = vrot.slane %v415_v35, 2  ;;  %526 = vmatpush.msra.mxu0 %v497_v21  ;;  %v606_v21 = vld [vmem:[%s1431_s3 + $0x8] sm:$0xf] }
  0x26   : > { %v467_v50 = vsel %vm449_vm8, %v460_v25, %v466_v45  ;;  %v447_v51 = vsel %vm446_vm7, %v437_v14, %v445_v46  ;;  %v413_v52 = vsel %vm1260_vm11, %v411_v43, %v412_v32  ;;  %v416_v53 = vsel %vm1260_vm11, %v414_v44, %v415_v35  ;;  %v1051_v32 = vld [vmem:[%s1430_s2] ss:$0 sm:$0xff]  ;;  %993 = vmatpush.msk.msra.mxu1 %vm507_vm12, %v606_v21 }
  0x27   : > { %487 = vrot.lane.b32.xlu0 %v467_v50, %s1130_s15  ;;  %v448_v54 = vsel %vm402_vm3, %v438_v16, %v447_v51  ;;  %v419_v55 = vsel %vm1260_vm11, %v417_v49, %v418_v36  ;;  %v420_v56 = vrot.slane %v418_v36, 2  ;;  %v421_v57 = vrot.slane %v394_v8, 7 }
  0x28   : > { %v450_v58 = vsel %vm449_vm8, %v439_v17, %v448_v54  ;;  %v424_v59 = vrot.slane %v1254_v9, 7  ;;  %v427_v60 = vrot.slane %v387_v47, 7  ;;  %v470_v61 = vperm.slane %v407_v39, 1 }
  0x29   : > { %v422_v62 = vsel %vm1260_vm11, %v420_v56, %v421_v57  ;;  %v423_v63 = vrot.slane %v421_v57, 2  ;;  %v471_v0 = vperm.slane %v410_v48, 1  ;;  %v452_v1 = vsel %vm431_vm10, -inf, %v450_v58 }
  0x2a   : > { %v426_v2 = vrot.slane %v424_v59, 2  ;;  %v472_v4 = vperm.slane %v413_v52, 1  ;;  %v473_v5 = vperm.slane %v416_v53, 1  ;;  %v474_v7 = vperm.slane %v419_v55, 1 }
  0x2b   : > { %v425_v6 = vsel %vm1260_vm11, %v423_v63, %v424_v59  ;;  %v475_v8 = vperm.slane %v422_v62, 1  ;;  %v478_v9 = vsel %vm440_vm5, %v471_v0, %v470_v61  ;;  %v469_v14 = vmax.f32 %v452_v1, %v467_v50 }
  0x2c   : > { %v428_v10 = vsel %vm1260_vm11, %v426_v2, %v427_v60  ;;  %v476_v11 = vperm.slane %v425_v6, 1  ;;  %v479_v12 = vsel %vm398_vm1, %v472_v4, %v478_v9  ;;  %v1132_v26 = vmov 1.4142135  }
  0x2d   : > { %v477_v13 = vperm.slane %v428_v10, 1  ;;  %v480_v3 = vsel %vm443_vm6, %v473_v5, %v479_v12  ;;  %1056 = vrcp.f32 %v1132_v26  ;;  %vm589_vm6 = vcmask 1046528  }
  0x2e   : > { %v481_v15 = vsel %vm400_vm2, %v474_v7, %v480_v3 }
  0x2f   : > { %v482_v16 = vsel %vm446_vm7, %v475_v8, %v481_v15  ;;  %vm596_vm7 = vcmask 1045504  }
  0x30   : > { %v483_v17 = vsel %vm402_vm3, %v476_v11, %v482_v16 }
  0x31   : > { %v484_v18 = vsel %vm449_vm8, %v477_v13, %v483_v17 }
  0x32   : > { %490 = vrot.lane.b32.xlu0 %v484_v18, %s1131_s16  ;;  %v1308_v19 = vmax.f32 %v469_v14, %v484_v18 }
  0x33   : > { %v1057_v27 = vpop.eup %1056 }
  0x34   : > { %v533_v28 = vmul.f32 1.4142135, %v1057_v27  ;;  %vm537_vm1 = vweird.f32 %v1057_v27 }
  0x36   : > { %v534_v29 = vsub.f32 1.0, %v533_v28 }
  0x38   : > { %v535_v30 = vmul.f32 %v1057_v27, %v534_v29 }
  0x3a   : > { %v536_v31 = vadd.f32 %v1057_v27, %v535_v30 }
  0x3c   : > { %v1323_v34 = vsel %vm537_vm1, %v1057_v27, %v536_v31  ;;  %v1052_v27 = vld [vmem:[%s1432_s4] ss:$0 sm:$0xff] }
  0x99   : > { %v488_v22 = vpop.permute.xlu0 %487 }
  0x9a   : > { %v494_v23 = vsel %vm493_vm13, %v450_v58, %v488_v22  ;;  %v605_v22 = vld [vmem:[%s1431_s3] sm:$0xff] }
  0x9b   : > { %632 = vmatpush.msra.mxu1 %v605_v22 }
  0xa4   : > { %v491_v24 = vpop.permute.xlu0 %490 }
  0xa5   : > { %v496_v25 = vsel %vm495_vm14, %v494_v23, %v491_v24 }
  0xa6   : > { %991 = vmatmul.msk.f32.vlgmr.msra.gmra.mxu0 %vm503_vm15, %v496_v25 }
 0x123   : > { %v528_v33 = vpop.f32.mrf.mxu0 }
 0x124   : > { %v529_v35 = vadd.f32 %v1051_v32, %v528_v33 }
 0x126   : > { %v539_v36 = vmul.f32 %v1323_v34, %v529_v35  ;;  %v531_v9 = vmul.f32 0.5, %v529_v35 }
 0x128   : > { %v540_v37 = vmul.f32 %v539_v36, %v539_v36 }
 0x12a   : > { %v541_v38 = vmin.f32 %v540_v37, 16.0 }
 0x12c   : > { %v542_v39 = vmul.f32 2.1237322e-06, %v541_v38  ;;  %v553_v40 = vmul.f32 3.8918573e-05, %v541_v38 }
 0x12e   : > { %v543_v41 = vadd.f32 0.00028619796, %v542_v39  ;;  %v554_v42 = vadd.f32 0.001143296, %v553_v40 }
 0x130   : > { %v544_v43 = vmul.f32 %v543_v41, %v541_v38  ;;  %v555_v44 = vmul.f32 %v554_v42, %v541_v38 }
 0x132   : > { %v556_v45 = vadd.f32 0.014752088, %v555_v44  ;;  %v545_v46 = vadd.f32 0.0036580483, %v544_v43 }
 0x134   : > { %v557_v47 = vmul.f32 %v556_v45, %v541_v38  ;;  %v546_v49 = vmul.f32 %v545_v46, %v541_v38  ;;  %v682_v45 = vld [vmem:[%s1437_s9] sm:$0xf] }
 0x135   : > { %996 = vmatpush.msk.msra.mxu2 %vm507_vm12, %v682_v45 }
 0x136   : > { %v558_v48 = vadd.f32 0.112945676, %v557_v47  ;;  %v547_v52 = vadd.f32 0.05243302, %v546_v49 }
 0x138   : > { %v559_v50 = vmul.f32 %v558_v48, %v541_v38  ;;  %v548_v55 = vmul.f32 %v547_v52, %v541_v38 }
 0x13a   : > { %v560_v51 = vadd.f32 0.4994258, %v559_v50  ;;  %v549_v56 = vadd.f32 0.18741608, %v548_v55 }
 0x13c   : > { %v561_v53 = vmul.f32 %v560_v51, %v541_v38  ;;  %v550_v58 = vmul.f32 %v549_v56, %v541_v38 }
 0x13e   : > { %v562_v54 = vadd.f32 1.0, %v561_v53  ;;  %v551_v62 = vadd.f32 1.1283791, %v550_v58 }
 0x140   : > { %1058 = vrcp.f32 %v562_v54  ;;  %v574_v61 = vand.u32 2147483648, %v562_v54  ;;  %v572_v0 = vand.u32 2147483647, %v562_v54  ;;  %vm568_vm3 = vweird.f32 %v562_v54 }
 0x141   : > { %v552_v4 = vmul.f32 %v551_v62, %v539_v36 }
 0x142   : > { %v575_v2 = vor.u32 1.1754944e-38, %v574_v61  ;;  %vm573_vm5 = vcmp.eq.f32.partialorder %v572_v0, 8.507059e+37 }
 0x146   : > { %v1059_v57 = vpop.eup %1058 }
 0x147   : > { %v564_v59 = vmul.f32 %v1059_v57, %v562_v54  ;;  %vm569_vm2 = vweird.f32 %v1059_v57 }
 0x148   : > { %vm570_vm4 = vmor %vm568_vm3, %vm569_vm2 }
 0x149   : > { %v565_v60 = vsub.f32 1.0, %v564_v59 }
 0x14b   : > { %v566_v63 = vmul.f32 %v1059_v57, %v565_v60 }
 0x14d   : > { %v567_v1 = vadd.f32 %v1059_v57, %v566_v63 }
 0x14f   : > { %v571_v5 = vsel %vm570_vm4, %v1059_v57, %v567_v1 }
 0x150   : > { %v576_v6 = vsel %vm573_vm5, %v575_v2, %v571_v5 }
 0x151   : > { %v577_v7 = vmul.f32 %v576_v6, %v552_v4 }
 0x153   : > { %v992_v8 = vclamps-f32 %v577_v7, 1.0 }
 0x155   : > { %v580_v10 = vadd.f32 1.0, %v992_v8 }
 0x157   : > { %v581_v11 = vmul.f32 %v580_v10, %v531_v9 }
 0x159   : > { %v583_v12 = vrot.slane %v581_v11, 7 }
 0x15b   : > { %v585_v13 = vsel %vm397_vm0, 0.0, %v583_v12  ;;  %v586_v3 = vsel %vm397_vm0, %v583_v12, 0.0 }
 0x15c   : > { %v590_v14 = vrot.slane %v585_v13, 1  ;;  %v591_v15 = vrot.slane %v586_v3, 1  ;;  %v597_v17 = vrot.slane %v585_v13, 2  ;;  %v598_v18 = vrot.slane %v586_v3, 2 }
 0x15e   : > { %v592_v16 = vsel %vm589_vm6, %v590_v14, %v591_v15  ;;  %v599_v20 = vsel %vm596_vm7, %v597_v17, %v598_v18  ;;  %v733_v17 = vld [vmem:[%s1433_s5] sm:$0xff] }
 0x15f   : > { %593 = vrot.lane.b32.xlu1 %v592_v16, %s1130_s15 }
 0x167   : > { %600 = vrot.lane.b32.xlu1 %v599_v20, %s1131_s16 }
 0x1d1   : > { %v594_v23 = vpop.permute.xlu1 %593 }
 0x1d2   : > { %v603_v24 = vsel %vm493_vm13, %v585_v13, %v594_v23  ;;  %v1054_v23 = vld [vmem:[%s1434_s6] ss:$0 sm:$0xff] }
 0x1d9   : > { %v601_v25 = vpop.permute.xlu1 %600 }
 0x1da   : > { %v604_v26 = vsel %vm495_vm14, %v603_v24, %v601_v25 }
 0x1db   : > { %994 = vmatmul.msk.f32.vlgmr.msra.gmra.mxu1 %vm503_vm15, %v604_v26 }
 0x258   : > { %v634_v28 = vpop.f32.mrf.mxu1 }
 0x259   : > { %v635_v29 = vadd.f32 %v1052_v27, %v634_v28 }
 0x25b   : > { %v638_v30 = vmul.f32 %v635_v29, %v1323_v34  ;;  %v637_v5 = vmul.f32 0.5, %v635_v29 }
 0x25d   : > { %v639_v31 = vmul.f32 %v638_v30, %v638_v30 }
 0x25f   : > { %v640_v32 = vmin.f32 %v639_v31, 16.0 }
 0x261   : > { %v641_v33 = vmul.f32 2.1237322e-06, %v640_v32  ;;  %v652_v35 = vmul.f32 3.8918573e-05, %v640_v32 }
 0x263   : > { %v642_v36 = vadd.f32 0.00028619796, %v641_v33  ;;  %v653_v37 = vadd.f32 0.001143296, %v652_v35 }
 0x265   : > { %v643_v38 = vmul.f32 %v642_v36, %v640_v32  ;;  %v654_v39 = vmul.f32 %v653_v37, %v640_v32 }
 0x267   : > { %v655_v40 = vadd.f32 0.014752088, %v654_v39  ;;  %v644_v41 = vadd.f32 0.0036580483, %v643_v38 }
 0x269   : > { %v656_v42 = vmul.f32 %v655_v40, %v640_v32  ;;  %v645_v44 = vmul.f32 %v644_v41, %v640_v32 }
 0x26b   : > { %v657_v43 = vadd.f32 0.112945676, %v656_v42  ;;  %v646_v48 = vadd.f32 0.05243302, %v645_v44 }
 0x26d   : > { %v658_v46 = vmul.f32 %v657_v43, %v640_v32  ;;  %v647_v51 = vmul.f32 %v646_v48, %v640_v32  ;;  %v830_v48 = vld [vmem:[%s1435_s7] sm:$0xff] }
 0x26f   : > { %v659_v47 = vadd.f32 0.4994258, %v658_v46  ;;  %v648_v52 = vadd.f32 0.18741608, %v647_v51 }
 0x271   : > { %v660_v49 = vmul.f32 %v659_v47, %v640_v32  ;;  %v649_v54 = vmul.f32 %v648_v52, %v640_v32  ;;  %v831_v47 = vld [vmem:[%s1435_s7 + $0x8] sm:$0xf] }
 0x272   : > { %1001 = vmatpush.msk.msrb.mxu2 %vm507_vm12, %v831_v47 }
 0x273   : > { %v661_v50 = vadd.f32 1.0, %v660_v49  ;;  %v650_v58 = vadd.f32 1.1283791, %v649_v54 }
 0x274   : > { %857 = vmatpush.msrb.mxu2 %v830_v48 }
 0x275   : > { %1060 = vrcp.f32 %v661_v50  ;;  %v673_v57 = vand.u32 2147483648, %v661_v50  ;;  %v671_v60 = vand.u32 2147483647, %v661_v50  ;;  %vm667_vm9 = vweird.f32 %v661_v50 }
 0x276   : > { %v651_v63 = vmul.f32 %v650_v58, %v638_v30 }
 0x277   : > { %v674_v62 = vor.u32 1.1754944e-38, %v673_v57  ;;  %vm672_vm11 = vcmp.eq.f32.partialorder %v671_v60, 8.507059e+37 }
 0x27b   : > { %v1061_v53 = vpop.eup %1060 }
 0x27c   : > { %v663_v55 = vmul.f32 %v1061_v53, %v661_v50  ;;  %vm668_vm8 = vweird.f32 %v1061_v53 }
 0x27d   : > { %vm669_vm10 = vmor %vm667_vm9, %vm668_vm8 }
 0x27e   : > { %v664_v56 = vsub.f32 1.0, %v663_v55 }
 0x280   : > { %v665_v59 = vmul.f32 %v1061_v53, %v664_v56 }
 0x282   : > { %v666_v61 = vadd.f32 %v1061_v53, %v665_v59 }
 0x284   : > { %v670_v0 = vsel %vm669_vm10, %v1061_v53, %v666_v61 }
 0x285   : > { %v675_v1 = vsel %vm672_vm11, %v674_v62, %v670_v0 }
 0x286   : > { %v676_v2 = vmul.f32 %v675_v1, %v651_v63 }
 0x288   : > { %v995_v4 = vclamps-f32 %v676_v2, 1.0 }
 0x28a   : > { %v679_v6 = vadd.f32 1.0, %v995_v4 }
 0x28c   : > { %v680_v7 = vmul.f32 %v679_v6, %v637_v5 }
 0x28e   : > { %v681_v8 = vadd.f32 %v680_v7, %v1308_v19  ;;  %v734_v19 = vld [vmem:[%s1433_s5 + $0x8] sm:$0xf] }
 0x28f   : > { %998 = vmatpush.msk.msra.mxu3 %vm507_vm12, %v734_v19 }
 0x290   : > { %997 = vmatmul.msk.f32.vlgmr.msra.gmra.mxu2 %vm493_vm13, %v681_v8  ;;  %v713_v9 = vrot.slane %v681_v8, 7 }
 0x291   : > { %760 = vmatpush.msra.mxu3 %v733_v17  ;;  %v1055_v17 = vld [vmem:[%s1436_s8] ss:$0 sm:$0xff] }
 0x292   : > { %v715_v10 = vsel %vm397_vm0, 0.0, %v713_v9  ;;  %v716_v11 = vsel %vm397_vm0, %v713_v9, 0.0 }
 0x293   : > { %v719_v12 = vrot.slane %v715_v10, 1  ;;  %v720_v13 = vrot.slane %v716_v11, 1  ;;  %v725_v14 = vrot.slane %v715_v10, 2  ;;  %v726_v15 = vrot.slane %v716_v11, 2 }
 0x295   : > { %v721_v3 = vsel %vm589_vm6, %v719_v12, %v720_v13  ;;  %v727_v16 = vsel %vm596_vm7, %v725_v14, %v726_v15 }
 0x296   : > { %722 = vrot.lane.b32.xlu2 %v721_v3, %s1130_s15 }
 0x29e   : > { %728 = vrot.lane.b32.xlu2 %v727_v16, %s1131_s16 }
 0x2f0   : > { %v723_v18 = vpop.permute.xlu2 %722 }
 0x2f1   : > { %v731_v20 = vsel %vm493_vm13, %v715_v10, %v723_v18 }
 0x2f8   : > { %v729_v21 = vpop.permute.xlu2 %728 }
 0x2f9   : > { %v732_v22 = vsel %vm495_vm14, %v731_v20, %v729_v21 }
 0x2fa   : > { %999 = vmatmul.msk.f32.vlgmr.msra.gmra.mxu3 %vm503_vm15, %v732_v22 }
 0x313   : > { %v710_v19 = vpop.f32.mrf.mxu2 }
 0x37d   : > { %v762_v24 = vpop.f32.mrf.mxu3 }
 0x37e   : > { %v763_v25 = vadd.f32 %v1054_v23, %v762_v24 }
 0x380   : > { %v766_v26 = vmul.f32 %v763_v25, %v1323_v34  ;;  %v765_v1 = vmul.f32 0.5, %v763_v25 }
 0x382   : > { %v767_v27 = vmul.f32 %v766_v26, %v766_v26 }
 0x384   : > { %v768_v28 = vmin.f32 %v767_v27, 16.0 }
 0x386   : > { %v769_v29 = vmul.f32 2.1237322e-06, %v768_v28  ;;  %v780_v30 = vmul.f32 3.8918573e-05, %v768_v28 }
 0x388   : > { %v770_v31 = vadd.f32 0.00028619796, %v769_v29  ;;  %v781_v32 = vadd.f32 0.001143296, %v780_v30 }
 0x38a   : > { %v771_v33 = vmul.f32 %v770_v31, %v768_v28  ;;  %v782_v35 = vmul.f32 %v781_v32, %v768_v28 }
 0x38c   : > { %v783_v36 = vadd.f32 0.014752088, %v782_v35  ;;  %v772_v37 = vadd.f32 0.0036580483, %v771_v33 }
 0x38e   : > { %v784_v38 = vmul.f32 %v783_v36, %v768_v28  ;;  %v773_v40 = vmul.f32 %v772_v37, %v768_v28 }
 0x390   : > { %v785_v39 = vadd.f32 0.112945676, %v784_v38  ;;  %v774_v43 = vadd.f32 0.05243302, %v773_v40 }
 0x392   : > { %v786_v41 = vmul.f32 %v785_v39, %v768_v28  ;;  %v775_v46 = vmul.f32 %v774_v43, %v768_v28 }
 0x394   : > { %v787_v42 = vadd.f32 0.4994258, %v786_v41  ;;  %v776_v49 = vadd.f32 0.18741608, %v775_v46 }
 0x396   : > { %v788_v44 = vmul.f32 %v787_v42, %v768_v28  ;;  %v777_v51 = vmul.f32 %v776_v49, %v768_v28 }
 0x398   : > { %v789_v45 = vadd.f32 1.0, %v788_v44  ;;  %v778_v55 = vadd.f32 1.1283791, %v777_v51 }
 0x39a   : > { %1062 = vrcp.f32 %v789_v45  ;;  %v801_v54 = vand.u32 2147483648, %v789_v45  ;;  %v799_v57 = vand.u32 2147483647, %v789_v45  ;;  %vm795_vm2 = vweird.f32 %v789_v45 }
 0x39b   : > { %v779_v60 = vmul.f32 %v778_v55, %v766_v26 }
 0x39c   : > { %v802_v59 = vor.u32 1.1754944e-38, %v801_v54  ;;  %vm800_vm4 = vcmp.eq.f32.partialorder %v799_v57, 8.507059e+37 }
 0x3a0   : > { %v1063_v50 = vpop.eup %1062 }
 0x3a1   : > { %v791_v52 = vmul.f32 %v1063_v50, %v789_v45  ;;  %vm796_vm1 = vweird.f32 %v1063_v50 }
 0x3a2   : > { %vm797_vm3 = vmor %vm795_vm2, %vm796_vm1 }
 0x3a3   : > { %v792_v53 = vsub.f32 1.0, %v791_v52 }
 0x3a5   : > { %v793_v56 = vmul.f32 %v1063_v50, %v792_v53 }
 0x3a7   : > { %v794_v58 = vadd.f32 %v1063_v50, %v793_v56  ;;  %v1053_v56 = vld [vmem:[%s1438_s10] ss:$0 sm:$0xff] }
 0x3a9   : > { %v798_v61 = vsel %vm797_vm3, %v1063_v50, %v794_v58 }
 0x3aa   : > { %v803_v62 = vsel %vm800_vm4, %v802_v59, %v798_v61 }
 0x3ab   : > { %v804_v63 = vmul.f32 %v803_v62, %v779_v60  ;;  %v711_v60 = vadd.f32 %v1053_v56, %v710_v19 }
 0x3ad   : > { %v1000_v0 = vclamps-f32 %v804_v63, 1.0 }
 0x3af   : > { %v807_v2 = vadd.f32 1.0, %v1000_v0 }
 0x3b1   : > { %v808_v4 = vmul.f32 %v807_v2, %v765_v1 }
 0x3b3   : > { %v810_v5 = vrot.slane %v808_v4, 7 }
 0x3b5   : > { %v812_v6 = vsel %vm397_vm0, 0.0, %v810_v5  ;;  %v813_v7 = vsel %vm397_vm0, %v810_v5, 0.0 }
 0x3b6   : > { %v822_v8 = vrot.slane %v812_v6, 2  ;;  %v823_v9 = vrot.slane %v813_v7, 2  ;;  %v816_v10 = vrot.slane %v812_v6, 1  ;;  %v817_v11 = vrot.slane %v813_v7, 1 }
 0x3b8   : > { %v824_v12 = vsel %vm596_vm7, %v822_v8, %v823_v9  ;;  %v818_v13 = vsel %vm589_vm6, %v816_v10, %v817_v11 }
 0x3b9   : > { %825 = vrot.lane.b32.xlu1 %v824_v12, %s1131_s16  ;;  %819 = vrot.lane.b32.xlu0 %v818_v13, %s1130_s15  ;;  %s377_s15 = sand.u32 1, %s1120_s18  }
 0x3ba   : > { %s987_s16 = sshll.u32 %s377_s15, 3  ;;  %s909_s21 = scalar_lea.sflag [#allocation3], %s377_s15 }
 0x3bb   : > { %s379_s22 = scalar_lea.vmem [#allocation2], %s987_s16  ;;  %s1086_s16 = scalar_lea.hbm %s1439_s11, 16 }
 0x3bc   : > { %s921_s24 = sshll.u32 %s379_s22, 4  ;;  %p1088_p1 = scmp.lt.s32.totalorder %s1086_s16, %s1082_s30  ;;  %s922_s24 = int_to_ptr.vmem [resolvable:$true] %s921_s24 }
 0x3be   : > { %p1089_p2 = por %p1088_p1, %p1087_p0 }
 0x3c0   : > { %p1090_p3 = pnand %p1089_p2, %p1085_p13 }
 0x42b   : > { %v826_v3 = vpop.permute.xlu1 %825  ;;  %v820_v14 = vpop.permute.xlu0 %819 }
 0x42c   : > { %v828_v15 = vsel %vm493_vm13, %v812_v6, %v820_v14 }
 0x42d   : > { %v829_v16 = vsel %vm495_vm14, %v828_v15, %v826_v3 }
 0x42e   : > { %1002 = vmatmul.msk.f32.vlgmr.msrb.gmra.mxu2 %vm503_vm15, %v829_v16 }
 0x4b1   : > { %v859_v18 = vpop.f32.mrf.mxu2 }
 0x4b2   : > { %v860_v20 = vadd.f32 %v1055_v17, %v859_v18 }
 0x4b4   : > { %v863_v21 = vmul.f32 %v860_v20, %v1323_v34  ;;  %v862_v58 = vmul.f32 0.5, %v860_v20 }
 0x4b6   : > { %v864_v22 = vmul.f32 %v863_v21, %v863_v21 }
 0x4b8   : > { %v865_v23 = vmin.f32 %v864_v22, 16.0 }
 0x4ba   : > { %v866_v24 = vmul.f32 2.1237322e-06, %v865_v23  ;;  %v877_v25 = vmul.f32 3.8918573e-05, %v865_v23 }
 0x4bc   : > { %v867_v26 = vadd.f32 0.00028619796, %v866_v24  ;;  %v878_v27 = vadd.f32 0.001143296, %v877_v25 }
 0x4be   : > { %v868_v28 = vmul.f32 %v867_v26, %v865_v23  ;;  %v879_v29 = vmul.f32 %v878_v27, %v865_v23 }
 0x4c0   : > { %v880_v30 = vadd.f32 0.014752088, %v879_v29  ;;  %v869_v31 = vadd.f32 0.0036580483, %v868_v28 }
 0x4c2   : > { %v881_v32 = vmul.f32 %v880_v30, %v865_v23  ;;  %v870_v35 = vmul.f32 %v869_v31, %v865_v23 }
 0x4c4   : > { %v882_v33 = vadd.f32 0.112945676, %v881_v32  ;;  %v871_v38 = vadd.f32 0.05243302, %v870_v35 }
 0x4c6   : > { %v883_v36 = vmul.f32 %v882_v33, %v865_v23  ;;  %v872_v34 = vmul.f32 %v871_v38, %v865_v23 }
 0x4c8   : > { %v884_v37 = vadd.f32 0.4994258, %v883_v36  ;;  %v873_v41 = vadd.f32 0.18741608, %v872_v34 }
 0x4ca   : > { %v885_v39 = vmul.f32 %v884_v37, %v865_v23  ;;  %v874_v43 = vmul.f32 %v873_v41, %v865_v23 }
 0x4cc   : > { %v886_v40 = vadd.f32 1.0, %v885_v39  ;;  %v875_v47 = vadd.f32 1.1283791, %v874_v43 }
 0x4ce   : > { %1064 = vrcp.f32 %v886_v40  ;;  %v898_v46 = vand.u32 2147483648, %v886_v40  ;;  %v896_v49 = vand.u32 2147483647, %v886_v40  ;;  %vm892_vm12 = vweird.f32 %v886_v40 }
 0x4cf   : > { %v876_v52 = vmul.f32 %v875_v47, %v863_v21 }
 0x4d0   : > { %v899_v51 = vor.u32 1.1754944e-38, %v898_v46  ;;  %vm897_vm15 = vcmp.eq.f32.partialorder %v896_v49, 8.507059e+37 }
 0x4d4   : > { %v1065_v42 = vpop.eup %1064 }
 0x4d5   : > { %v888_v44 = vmul.f32 %v1065_v42, %v886_v40  ;;  %vm893_vm0 = vweird.f32 %v1065_v42 }
 0x4d6   : > { %vm894_vm13 = vmor %vm892_vm12, %vm893_vm0 }
 0x4d7   : > { %v889_v45 = vsub.f32 1.0, %v888_v44 }
 0x4d9   : > { %v890_v48 = vmul.f32 %v1065_v42, %v889_v45 }
 0x4db   : > { %v891_v50 = vadd.f32 %v1065_v42, %v890_v48 }
 0x4dd   : > { %v895_v53 = vsel %vm894_vm13, %v1065_v42, %v891_v50 }
 0x4de   : > { %v900_v54 = vsel %vm897_vm15, %v899_v51, %v895_v53 }
 0x4df   : > { %v901_v55 = vmul.f32 %v900_v54, %v876_v52 }
 0x4e1   : > { %v1003_v57 = vclamps-f32 %v901_v55, 1.0 }
 0x4e3   : > { %v904_v59 = vadd.f32 1.0, %v1003_v57 }
 0x4e5   : > { %v905_v61 = vmul.f32 %v904_v59, %v862_v58 }
 0x4e7   : > { %v906_v62 = vadd.f32 %v905_v61, %v711_v60 }
 0x4e9   : > { %907 = vst.msk [vmem:[%s379_s22] sm:$0xff] %vm495_vm14, %v906_v62 }
 0x4ea   : > { %1093 = shalt.err (!%p1090_p3)
}
 0x4eb   : > { %1009 = dma.vmem_to_hbm [thread:$0]  (%p1231_p5), %s922_s24, 128, %s924_s0, %s909_s21  }
 0x4ec PF: > { %p1015_p4 = scmp.ge.s32.totalorder %s1128_s20, 2  ;;  %s935_s15 = sand.u32 1, %s1116_s17  }
 0x4ed   : > { %s936_s22 = scalar_lea.sflag [#allocation3], %s935_s15 }
 0x4ee   : > { %p1012_p7 = pnand %p1015_p4, %p1235_p6 }
 0x4f0   : > { %p1013_p8 = pneg %p1012_p7 }
 0x4f2   : > { %1111 = dma.done.wait (%p1013_p8), %s936_s22, 128  }
 0x4f3   : > { %1113 = vsyncadd (%p1013_p8), %s936_s22, 4294967168  ;;  %p21_p9 = scmp.ge.s32.totalorder %s1218_s23, 4   ;;  %s1446_s17 = smov %s1120_s18 }
 0x4f4   : > { %s1447_s18 = smov %s1124_s19  ;;  %s1448_s19 = smov %s1229_s26 }
 0x4f5   : > { %s1449_s20 = smov %s1218_s23  ;;  %23 = sbr.rel (!%p21_p9) target bundleno = 5 (0x5), region = 99 }
 0x4fa   :  { %942 = vsyncpa [#allocation3], 1 }
 0x4fb   :  { %944 = vsyncpa [#allocation3 + $0x1], 1 }

</bundles_post_ra>
